<compile_context>
chip_gen: v6e
topology: v6e:2x2x1
jax: 0.10.0
libtpu: 0.0.40
codegen_flags: <defaults>
</compile_context>

<pallas_src>
import jax
import jax.numpy as jnp
from jax.experimental import pallas as pl
from jax.experimental.pallas import tpu as pltpu

_LANE = 128


def _round_up(x, m):
    return (x + m - 1) // m * m


def _fdm_kernel(ctx_ref, la_ref, w1c_ref, w1l_ref, b1_ref,
                w2_ref, b2_ref, w3_ref, b3_ref, out_ref):
    """Fused MLP encoder (2x Linear+ReLU) + output Linear, all in VMEM / MXU.

    Layer 1 is a split-K matmul (ctx part + la part) which replaces the
    host-side concat([context, la]) of the PyTorch forward.  Activations arrive
    already in the MXU compute dtype; accumulation is always f32.
    """
    cdt = w1c_ref.dtype                          # MXU compute dtype (f32 or bf16)

    # encoder layer 1 (split-K; f32 accumulation)
    h = jnp.dot(ctx_ref[...], w1c_ref[...], preferred_element_type=jnp.float32)
    h = h + jnp.dot(la_ref[...], w1l_ref[...], preferred_element_type=jnp.float32)
    h = jnp.maximum(h + b1_ref[...], 0.0)

    # encoder layer 2
    h = jnp.dot(h.astype(cdt), w2_ref[...], preferred_element_type=jnp.float32)
    h = jnp.maximum(h + b2_ref[...], 0.0)

    # to_observation (nn.Linear(hidden, input_dim), lane-padded output)
    y = jnp.dot(h.astype(cdt), w3_ref[...], preferred_element_type=jnp.float32)
    y = y + b3_ref[...]
    out_ref[...] = y.astype(out_ref.dtype)


def _pick_batch_tile(B):
    """MXU-friendly batch tiles (multiples of 8 sublanes; prefer 256/512 to fill the
    v6e/v7x 256-wide MXU M dim and amortize ~0.35us/grid-step overhead).  Keeps >= 2
    grid steps whenever B allows so the 'parallel' axis can shard across both v7x
    TensorCores.  Any B is handled via cdiv + batch padding in the wrapper."""
    if B >= 1024:
        return 512
    if B >= 512:
        return 256
    if B >= 16:
        return max(8, min(256, (B // 2) // 8 * 8))
    return 8


def fdm_forward(observations, la, packed_params, *, context_len, out_dim,
                out_dtype=jnp.float32):
    """observations: (B, T, D) float32, la: (B, la_dim) float32."""
    B, T, D = observations.shape
    w1c, w1l, b1, w2, b2, w3, b3 = packed_params
    cdt = w1c.dtype
    wbytes = w1c.dtype.itemsize
    ctx_p, hid_p = w1c.shape
    la_p = w1l.shape[0]
    out_p = w3.shape[1]
    ctx_dim = context_len * D
    assert ctx_dim <= ctx_p and la.shape[1] <= la_p

    tb = _pick_batch_tile(B)
    n_b = pl.cdiv(B, tb)
    Bp = n_b * tb

    # matches torch: observations[:, :context_len].flatten(start_dim=1),
    # plus lane/batch zero-padding and cast to the MXU compute dtype, all fused into
    # the one XLA pre-pass the flatten already needs.
    # TODO(synk): for very large context_len*D a (tb, context_len, D) BlockSpec on
    #             observations would avoid this HBM round-trip entirely.
    ctx = observations[:, :context_len].reshape(B, ctx_dim)
    ctx = jnp.pad(ctx, ((0, Bp - B), (0, ctx_p - ctx_dim))).astype(cdt)
    la_in = jnp.pad(la, ((0, Bp - B), (0, la_p - la.shape[1]))).astype(cdt)

    # activation tiles: default 2-deep pipelining (pipeline_mode=pl.Buffered(3) is a
    # cheap sweep if DMA latency is exposed at tiny hidden sizes).
    act_spec = lambda f: pl.BlockSpec((tb, f), lambda i: (i, 0))
    # constant index_map + single buffering -> weights/biases fetched once and resident
    # in VMEM without the 2x double-buffer copy.
    res_spec = lambda a: pl.BlockSpec(a.shape, lambda i: (0, 0),
                                      pipeline_mode=pl.Buffered(1))

    out_bytes = jnp.dtype(out_dtype).itemsize
    weight_bytes = ((ctx_p + la_p + hid_p) * hid_p + hid_p * out_p) * wbytes
    bias_bytes = (2 * hid_p + out_p) * 4
    # VMEM footprint: single-buffered weights + f32 biases + 2x-buffered activation
    # and output tiles + in-kernel f32 intermediate h and its compute-dtype cast.
    vmem_est = (weight_bytes + bias_bytes
                + 2 * tb * (ctx_p + la_p) * wbytes
                + 2 * tb * out_p * out_bytes
                + tb * hid_p * (4 + wbytes))
    vmem_limit = int(min(100 * 2**20, max(32 * 2**20, 2 * vmem_est)))

    flops = 2 * Bp * hid_p * (ctx_p + la_p + hid_p + out_p)
    bytes_accessed = (Bp * (ctx_p + la_p) * wbytes
                      + weight_bytes + bias_bytes
                      + Bp * out_p * out_bytes)

    out = pl.pallas_call(
        _fdm_kernel,
        out_shape=jax.ShapeDtypeStruct((Bp, out_p), out_dtype),
        grid_spec=pltpu.PrefetchScalarGridSpec(
            num_scalar_prefetch=0,
            grid=(n_b,),
            in_specs=[act_spec(ctx_p), act_spec(la_p),
                      res_spec(w1c), res_spec(w1l), res_spec(b1),
                      res_spec(w2), res_spec(b2),
                      res_spec(w3), res_spec(b3)],
            out_specs=pl.BlockSpec((tb, out_p), lambda i: (i, 0)),
        ),
        compiler_params=pltpu.CompilerParams(
            dimension_semantics=("parallel",),
            vmem_limit_bytes=vmem_limit),
        cost_estimate=pl.CostEstimate(flops=int(flops), transcendentals=0,
                                      bytes_accessed=int(bytes_accessed)),
    )(ctx, la_in, w1c, w1l, b1, w2, b2, w3, b3)

    # kernel output is batch- and lane-padded; slice back to the logical shape.
    return out[:B, :out_dim]


def init_params(key, in_dim, hidden_dim, out_dim):
    """Logical (unpadded) params, stored (in, out) so the kernel computes x @ W + b."""
    ks = jax.random.split(key, 6)

    def lin(kw, kb, fan_in, fan_out):
        bound = 1.0 / jnp.sqrt(fan_in)
        w = jax.random.uniform(kw, (fan_in, fan_out), jnp.float32, -bound, bound)
        b = jax.random.uniform(kb, (1, fan_out), jnp.float32, -bound, bound)
        return w, b

    w1, b1 = lin(ks[0], ks[1], in_dim, hidden_dim)      # encoder layer 1
    w2, b2 = lin(ks[2], ks[3], hidden_dim, hidden_dim)  # encoder layer 2
    w3, b3 = lin(ks[4], ks[5], hidden_dim, out_dim)     # to_observation
    return (w1, b1, w2, b2, w3, b3)


def pack_params(params, *, ctx_dim, compute_dtype=jnp.bfloat16):
    """Split W1 at the ctx/la boundary, zero-pad ALL feature dims (ctx, la, hidden,
    out) to 128-lane multiples (numerically exact), and cast weights to the MXU
    compute dtype.  Biases stay f32 (added into the f32 accumulator).  Do this ONCE,
    outside the step function."""
    w1, b1, w2, b2, w3, b3 = params
    in_dim, hid = w1.shape
    la_dim = in_dim - ctx_dim
    out_dim = w3.shape[1]
    ctx_p = _round_up(ctx_dim, _LANE)
    la_p = _round_up(la_dim, _LANE)
    hid_p = _round_up(hid, _LANE)
    out_p = _round_up(out_dim, _LANE)

    def pad_to(a, rows, cols):
        return jnp.pad(a, ((0, rows - a.shape[0]), (0, cols - a.shape[1])))

    w1c = pad_to(w1[:ctx_dim], ctx_p, hid_p).astype(compute_dtype)
    w1l = pad_to(w1[ctx_dim:], la_p, hid_p).astype(compute_dtype)
    b1p = pad_to(b1, 1, hid_p)
    w2p = pad_to(w2, hid_p, hid_p).astype(compute_dtype)
    b2p = pad_to(b2, 1, hid_p)
    w3p = pad_to(w3, hid_p, out_p).astype(compute_dtype)
    b3p = pad_to(b3, 1, out_p)
    return (w1c, w1l, b1p, w2p, b2p, w3p, b3p), out_dim


def _reference(observations, la, params, *, context_len):
    """Pure-JAX reference for correctness check."""
    B, T, D = observations.shape
    context = observations[:, :context_len].reshape(B, context_len * D)
    x = jnp.concatenate([context, la], axis=-1)
    w1, b1, w2, b2, w3, b3 = params
    h = jnp.maximum(x @ w1 + b1, 0.0)
    h = jnp.maximum(h @ w2 + b2, 0.0)
    return h @ w3 + b3


if __name__ == "__main__":
    # small shapes consistent with the module (vector-obs path)
    B = 2            # batch
    T = 8            # sequence length of observations
    input_dim = 4    # per-step observation dim
    context_len = 2
    la_dim = 8
    hidden_dim = 32  # make_mlp hidden / output_dim

    key = jax.random.PRNGKey(0)
    k_obs, k_la, k_par = jax.random.split(key, 3)
    observations = jax.random.normal(k_obs, (B, T, input_dim), jnp.float32)
    la = jax.random.normal(k_la, (B, la_dim), jnp.float32)  # idm_output.la

    ctx_dim = input_dim * context_len
    prev_dim = ctx_dim + la_dim
    params = init_params(k_par, prev_dim, hidden_dim, input_dim)
    ref = _reference(observations, la, params, context_len=context_len)

    # f32 MXU path (tight correctness check)
    packed32, out_dim = pack_params(params, ctx_dim=ctx_dim, compute_dtype=jnp.float32)
    out32 = jax.block_until_ready(
        fdm_forward(observations, la, packed32, context_len=context_len, out_dim=out_dim))
    assert out32.shape == (B, input_dim), out32.shape
    assert jnp.allclose(out32, ref, atol=1e-4, rtol=1e-4), "f32 mismatch vs reference"

    # bf16 production path (bf16 weights/activations/output, f32 accumulation)
    packed16, _ = pack_params(params, ctx_dim=ctx_dim, compute_dtype=jnp.bfloat16)
    out16 = jax.block_until_ready(
        fdm_forward(observations, la, packed16, context_len=context_len,
                    out_dim=out_dim, out_dtype=jnp.bfloat16))
    assert out16.shape == (B, input_dim), out16.shape
    assert out16.dtype == jnp.bfloat16, out16.dtype
    assert jnp.allclose(out16.astype(jnp.float32), ref, atol=5e-2, rtol=5e-2), \
        "bf16 mismatch vs reference"

    print("KERNEL_OK")
</pallas_src>

<mosaic_0001>
module attributes {stable_mosaic.version = 11 : i64} {
  func.func @_fdm_kernel(%arg0: i32, %arg1: memref<8x128xf32, #tpu.memory_space<vmem>>, %arg2: memref<8x128xf32, #tpu.memory_space<vmem>>, %arg3: memref<128x128xf32, #tpu.memory_space<vmem>>, %arg4: memref<128x128xf32, #tpu.memory_space<vmem>>, %arg5: memref<1x128xf32, #tpu.memory_space<vmem>>, %arg6: memref<128x128xf32, #tpu.memory_space<vmem>>, %arg7: memref<1x128xf32, #tpu.memory_space<vmem>>, %arg8: memref<128x128xf32, #tpu.memory_space<vmem>>, %arg9: memref<1x128xf32, #tpu.memory_space<vmem>>, %arg10: memref<8x128xf32, #tpu.memory_space<vmem>>) attributes {dimension_semantics = [#tpu.dimension_semantics<parallel>], iteration_bounds = array<i64: 1>, scalar_prefetch = 0 : i64, scratch_operands = 0 : i64, tpu.core_type = #tpu.core_type<tc>, window_params = [{transform_indices = @transform_0, window_bounds = array<i64: 8, 128>}, {transform_indices = @transform_1, window_bounds = array<i64: 8, 128>}, {pipeline_mode = #tpu.pipeline_mode<synchronous>, transform_indices = @transform_2, window_bounds = array<i64: 128, 128>}, {pipeline_mode = #tpu.pipeline_mode<synchronous>, transform_indices = @transform_3, window_bounds = array<i64: 128, 128>}, {pipeline_mode = #tpu.pipeline_mode<synchronous>, transform_indices = @transform_4, window_bounds = array<i64: 1, 128>}, {pipeline_mode = #tpu.pipeline_mode<synchronous>, transform_indices = @transform_5, window_bounds = array<i64: 128, 128>}, {pipeline_mode = #tpu.pipeline_mode<synchronous>, transform_indices = @transform_6, window_bounds = array<i64: 1, 128>}, {pipeline_mode = #tpu.pipeline_mode<synchronous>, transform_indices = @transform_7, window_bounds = array<i64: 128, 128>}, {pipeline_mode = #tpu.pipeline_mode<synchronous>, transform_indices = @transform_8, window_bounds = array<i64: 1, 128>}, {transform_indices = @transform_9, window_bounds = array<i64: 8, 128>}]} {
    %c0 = arith.constant 0 : index
    %c0_0 = arith.constant 0 : index
    %0 = vector.load %arg1[%c0, %c0_0] : memref<8x128xf32, #tpu.memory_space<vmem>>, vector<8x128xf32>
    %c0_1 = arith.constant 0 : index
    %c0_2 = arith.constant 0 : index
    %1 = vector.load %arg3[%c0_1, %c0_2] : memref<128x128xf32, #tpu.memory_space<vmem>>, vector<128x128xf32>
    %cst = arith.constant dense<0.000000e+00> : vector<8x128xf32>
    %2 = tpu.matmul %0, %1, %cst {dimension_numbers = #tpu.dot_dimension_numbers<[1], [0], [0], [1], [0, 0, 1, 1], [], []>} : vector<8x128xf32>, vector<128x128xf32>, vector<8x128xf32> -> vector<8x128xf32>
    %c0_3 = arith.constant 0 : index
    %c0_4 = arith.constant 0 : index
    %3 = vector.load %arg2[%c0_3, %c0_4] : memref<8x128xf32, #tpu.memory_space<vmem>>, vector<8x128xf32>
    %c0_5 = arith.constant 0 : index
    %c0_6 = arith.constant 0 : index
    %4 = vector.load %arg4[%c0_5, %c0_6] : memref<128x128xf32, #tpu.memory_space<vmem>>, vector<128x128xf32>
    %cst_7 = arith.constant dense<0.000000e+00> : vector<8x128xf32>
    %5 = tpu.matmul %3, %4, %cst_7 {dimension_numbers = #tpu.dot_dimension_numbers<[1], [0], [0], [1], [0, 0, 1, 1], [], []>} : vector<8x128xf32>, vector<128x128xf32>, vector<8x128xf32> -> vector<8x128xf32>
    %6 = arith.addf %2, %5 : vector<8x128xf32>
    %c0_8 = arith.constant 0 : index
    %c0_9 = arith.constant 0 : index
    %7 = vector.load %arg5[%c0_8, %c0_9] : memref<1x128xf32, #tpu.memory_space<vmem>>, vector<1x128xf32>
    %8 = vector.broadcast %7 : vector<1x128xf32> to vector<8x128xf32>
    %9 = arith.addf %6, %8 : vector<8x128xf32>
    %cst_10 = arith.constant 0.000000e+00 : f32
    %10 = vector.broadcast %cst_10 : f32 to vector<8x128xf32>
    %11 = arith.maximumf %9, %10 : vector<8x128xf32>
    %c0_11 = arith.constant 0 : index
    %c0_12 = arith.constant 0 : index
    %12 = vector.load %arg6[%c0_11, %c0_12] : memref<128x128xf32, #tpu.memory_space<vmem>>, vector<128x128xf32>
    %cst_13 = arith.constant dense<0.000000e+00> : vector<8x128xf32>
    %13 = tpu.matmul %11, %12, %cst_13 {dimension_numbers = #tpu.dot_dimension_numbers<[1], [0], [0], [1], [0, 0, 1, 1], [], []>} : vector<8x128xf32>, vector<128x128xf32>, vector<8x128xf32> -> vector<8x128xf32>
    %c0_14 = arith.constant 0 : index
    %c0_15 = arith.constant 0 : index
    %14 = vector.load %arg7[%c0_14, %c0_15] : memref<1x128xf32, #tpu.memory_space<vmem>>, vector<1x128xf32>
    %15 = vector.broadcast %14 : vector<1x128xf32> to vector<8x128xf32>
    %16 = arith.addf %13, %15 : vector<8x128xf32>
    %cst_16 = arith.constant 0.000000e+00 : f32
    %17 = vector.broadcast %cst_16 : f32 to vector<8x128xf32>
    %18 = arith.maximumf %16, %17 : vector<8x128xf32>
    %c0_17 = arith.constant 0 : index
    %c0_18 = arith.constant 0 : index
    %19 = vector.load %arg8[%c0_17, %c0_18] : memref<128x128xf32, #tpu.memory_space<vmem>>, vector<128x128xf32>
    %cst_19 = arith.constant dense<0.000000e+00> : vector<8x128xf32>
    %20 = tpu.matmul %18, %19, %cst_19 {dimension_numbers = #tpu.dot_dimension_numbers<[1], [0], [0], [1], [0, 0, 1, 1], [], []>} : vector<8x128xf32>, vector<128x128xf32>, vector<8x128xf32> -> vector<8x128xf32>
    %c0_20 = arith.constant 0 : index
    %c0_21 = arith.constant 0 : index
    %21 = vector.load %arg9[%c0_20, %c0_21] : memref<1x128xf32, #tpu.memory_space<vmem>>, vector<1x128xf32>
    %22 = vector.broadcast %21 : vector<1x128xf32> to vector<8x128xf32>
    %23 = arith.addf %20, %22 : vector<8x128xf32>
    %c0_22 = arith.constant 0 : index
    %c0_23 = arith.constant 0 : index
    %24 = vector.load %arg10[%c0_22, %c0_23] : memref<8x128xf32, #tpu.memory_space<vmem>>, vector<8x128xf32>
    tpu.vector_store %arg10[%c0_22, %c0_23], %23 {strides = array<i32>} : memref<8x128xf32, #tpu.memory_space<vmem>>, vector<8x128xf32>,
    return
  }
  func.func @transform_0(%arg0: i32) -> (i32, i32) {
    %c0_i32 = arith.constant 0 : i32
    %c0_i32_0 = arith.constant 0 : i32
    return %arg0, %c0_i32 : i32, i32
  }
  func.func @transform_1(%arg0: i32) -> (i32, i32) {
    %c0_i32 = arith.constant 0 : i32
    %c0_i32_0 = arith.constant 0 : i32
    return %arg0, %c0_i32 : i32, i32
  }
  func.func @transform_2(%arg0: i32) -> (i32, i32) {
    %c0_i32 = arith.constant 0 : i32
    %c0_i32_0 = arith.constant 0 : i32
    %c0_i32_1 = arith.constant 0 : i32
    return %c0_i32, %c0_i32_0 : i32, i32
  }
  func.func @transform_3(%arg0: i32) -> (i32, i32) {
    %c0_i32 = arith.constant 0 : i32
    %c0_i32_0 = arith.constant 0 : i32
    %c0_i32_1 = arith.constant 0 : i32
    return %c0_i32, %c0_i32_0 : i32, i32
  }
  func.func @transform_4(%arg0: i32) -> (i32, i32) {
    %c0_i32 = arith.constant 0 : i32
    %c0_i32_0 = arith.constant 0 : i32
    %c0_i32_1 = arith.constant 0 : i32
    return %c0_i32, %c0_i32_0 : i32, i32
  }
  func.func @transform_5(%arg0: i32) -> (i32, i32) {
    %c0_i32 = arith.constant 0 : i32
    %c0_i32_0 = arith.constant 0 : i32
    %c0_i32_1 = arith.constant 0 : i32
    return %c0_i32, %c0_i32_0 : i32, i32
  }
  func.func @transform_6(%arg0: i32) -> (i32, i32) {
    %c0_i32 = arith.constant 0 : i32
    %c0_i32_0 = arith.constant 0 : i32
    %c0_i32_1 = arith.constant 0 : i32
    return %c0_i32, %c0_i32_0 : i32, i32
  }
  func.func @transform_7(%arg0: i32) -> (i32, i32) {
    %c0_i32 = arith.constant 0 : i32
    %c0_i32_0 = arith.constant 0 : i32
    %c0_i32_1 = arith.constant 0 : i32
    return %c0_i32, %c0_i32_0 : i32, i32
  }
  func.func @transform_8(%arg0: i32) -> (i32, i32) {
    %c0_i32 = arith.constant 0 : i32
    %c0_i32_0 = arith.constant 0 : i32
    %c0_i32_1 = arith.constant 0 : i32
    return %c0_i32, %c0_i32_0 : i32, i32
  }
  func.func @transform_9(%arg0: i32) -> (i32, i32) {
    %c0_i32 = arith.constant 0 : i32
    %c0_i32_0 = arith.constant 0 : i32
    return %arg0, %c0_i32 : i32, i32
  }
}

</mosaic_0001>

<bundles_post_ra>
// kernel: tpu_custom_call.1
= control target key start
LH: loop header
LB: loop body
LE: loop exit
PB: predicated region body
PF: predicated region fallthrough
CT: control target
= control target key end

     0   :  { %14 = vsyncpa [#allocation3], 0  ;;  %s1047_s0 = inlined_call_operand.hbm [shape: f32[8,128], index: 0, kind: input, shape index: {}]   ;;  %s1048_s1 = inlined_call_operand.hbm [shape: f32[8,128], index: 1, kind: input, shape index: {}]   ;;  %s1049_s2 = inlined_call_operand.hbm [shape: f32[128,128], index: 2, kind: input, shape index: {}]   ;;  %s1050_s3 = inlined_call_operand.hbm [shape: f32[128,128], index: 3, kind: input, shape index: {}]   ;;  %s1051_s4 = inlined_call_operand.vmem [shape: f32[1,128], index: 4, kind: input, shape index: {}]   ;;  %s1052_s5 = inlined_call_operand.hbm [shape: f32[128,128], index: 5, kind: input, shape index: {}]   ;;  %s1053_s6 = inlined_call_operand.vmem [shape: f32[1,128], index: 6, kind: input, shape index: {}]   ;;  %s1054_s7 = inlined_call_operand.hbm [shape: f32[128,128], index: 7, kind: input, shape index: {}]   ;;  %s1055_s8 = inlined_call_operand.vmem [shape: f32[1,128], index: 8, kind: input, shape index: {}]   ;;  %s1056_s9 = inlined_call_operand.hbm [shape: f32[8,128], index: 9, kind: output, shape index: {}]  }
   0x1   :  { %15 = vsyncpa [#allocation6], 0 }
   0x2   :  { %16 = vsyncpa [#allocation9], 0 }
   0x3   :  { %17 = vsyncpa [#allocation12], 0 }
   0x4   :  { %18 = vsyncpa [#allocation4], 0  ;;  %s872_s30 = smov [#allocation5]  }
   0x5   :  { %s35_s10 = sshll.u32 %s872_s30, 4  ;;  %s36_s10 = int_to_ptr.vmem [resolvable:$true] %s35_s10 }
   0x6   :  { %s730_s11 = scalar_lea.vmem %s36_s10, 128  ;;  %p735_p1 = scmp.lt.s32.totalorder %s36_s10, %s36_s10 }
   0x7   :  { %p731_p0 = scmp.ne.s32.totalorder %s36_s10, %s730_s11  ;;  %p736_p2 = scmp.lt.s32.totalorder %s730_s11, %s730_s11 }
   0x9   :  { %p737_p3 = por %p736_p2, %p735_p1 }
   0xb   :  { %p738_p4 = pnand %p737_p3, %p731_p0 }
   0xd   :  { %741 = shalt.err (!%p738_p4)
}
   0xe   :  { %38 = dma.hbm_to_vmem [thread:$0]  %s1048_s1, 128, %s36_s10, [#allocation6]  }
   0xf   :  { %s873_s14 = smov [#allocation8]   ;;  %s874_s16 = smov [#allocation2]  }
  0x10   :  { %s56_s15 = sshll.u32 %s873_s14, 4  ;;  %s25_s17 = sshll.u32 %s874_s16, 4  ;;  %s57_s15 = int_to_ptr.vmem [resolvable:$true] %s56_s15  ;;  %s26_s17 = int_to_ptr.vmem [resolvable:$true] %s25_s17 }
  0x11   :  { %s750_s18 = scalar_lea.vmem %s57_s15, 2048  ;;  %p755_p6 = scmp.lt.s32.totalorder %s57_s15, %s57_s15 }
  0x12   :  { %p751_p5 = scmp.ne.s32.totalorder %s57_s15, %s750_s18  ;;  %p756_p7 = scmp.lt.s32.totalorder %s750_s18, %s750_s18 }
  0x14   :  { %p757_p8 = por %p756_p7, %p755_p6 }
  0x16   :  { %p758_p9 = pnand %p757_p8, %p751_p5 }
  0x18   :  { %761 = shalt.err (!%p758_p9)
}
  0x19   :  { %s875_s19 = smov 128   ;;  %s876_s20 = smov 8  }
  0x1a   :  { %62 = dma.hbm_to_vmem [thread:$0]  %s1050_s3, 2048, %s57_s15, [#allocation9], %s875_s19, %s875_s19, %s876_s20  }
  0x1b   :  { %s770_s1 = scalar_lea.vmem %s26_s17, 128  ;;  %p775_p11 = scmp.lt.s32.totalorder %s26_s17, %s26_s17 }
  0x1c   :  { %p771_p10 = scmp.ne.s32.totalorder %s26_s17, %s770_s1  ;;  %p776_p12 = scmp.lt.s32.totalorder %s770_s1, %s770_s1 }
  0x1e   :  { %p777_p13 = por %p776_p12, %p775_p11 }
  0x20   :  { %p778_p0 = pnand %p777_p13, %p771_p10 }
  0x22   :  { %781 = shalt.err (!%p778_p0)
}
  0x23   :  { %28 = dma.hbm_to_vmem [thread:$0]  %s1047_s0, 128, %s26_s17, [#allocation3]  }
  0x24   :  { %s877_s25 = smov [#allocation7]   ;;  %s878_s27 = smov [#allocation10]  }
  0x25   :  { %s44_s26 = sshll.u32 %s877_s25, 4  ;;  %s70_s28 = sshll.u32 %s878_s27, 4  ;;  %s45_s26 = int_to_ptr.vmem [resolvable:$true] %s44_s26  ;;  %s71_s28 = int_to_ptr.vmem [resolvable:$true] %s70_s28 }
  0x26   :  { %s790_s29 = scalar_lea.vmem %s45_s26, 2048  ;;  %p795_p2 = scmp.lt.s32.totalorder %s45_s26, %s45_s26 }
  0x27   :  { %p791_p1 = scmp.ne.s32.totalorder %s45_s26, %s790_s29  ;;  %p796_p3 = scmp.lt.s32.totalorder %s790_s29, %s790_s29 }
  0x29   :  { %p797_p4 = por %p796_p3, %p795_p2 }
  0x2b   :  { %p798_p5 = pnand %p797_p4, %p791_p1 }
  0x2d   :  { %801 = shalt.err (!%p798_p5)
}
  0x2e   :  { %50 = dma.hbm_to_vmem [thread:$0]  %s1049_s2, 2048, %s45_s26, [#allocation6], %s875_s19, %s875_s19, %s876_s20  }
  0x2f   :  { %s810_s0 = scalar_lea.vmem %s71_s28, 2048  ;;  %p815_p7 = scmp.lt.s32.totalorder %s71_s28, %s71_s28 }
  0x30   :  { %p811_p6 = scmp.ne.s32.totalorder %s71_s28, %s810_s0  ;;  %p816_p8 = scmp.lt.s32.totalorder %s810_s0, %s810_s0 }
  0x32   :  { %p817_p9 = por %p816_p8, %p815_p7 }
  0x34   :  { %p818_p10 = pnand %p817_p9, %p811_p6 }
  0x36   :  { %821 = shalt.err (!%p818_p10)
}
  0x37   :  { %76 = dma.hbm_to_vmem [thread:$0]  %s1052_s5, 2048, %s71_s28, [#allocation9], %s875_s19, %s875_s19, %s876_s20  }
  0x38   :  { %s879_s12 = smov [#allocation11]  }
  0x39   :  { %s84_s13 = sshll.u32 %s879_s12, 4  ;;  %s85_s13 = int_to_ptr.vmem [resolvable:$true] %s84_s13 }
  0x3a   :  { %s830_s14 = scalar_lea.vmem %s85_s13, 2048  ;;  %p835_p12 = scmp.lt.s32.totalorder %s85_s13, %s85_s13 }
  0x3b   :  { %p831_p11 = scmp.ne.s32.totalorder %s85_s13, %s830_s14  ;;  %p836_p13 = scmp.lt.s32.totalorder %s830_s14, %s830_s14 }
  0x3d   :  { %p837_p0 = por %p836_p13, %p835_p12 }
  0x3f   :  { %p838_p1 = pnand %p837_p0, %p831_p11 }
  0x41   :  { %841 = shalt.err (!%p838_p1)
}
  0x42   :  { %90 = dma.hbm_to_vmem [thread:$0]  %s1054_s7, 2048, %s85_s13, [#allocation12], %s875_s19, %s875_s19, %s876_s20  }
  0x43   :  { %862 = dma.done.wait [#allocation3], 128  }
  0x44   :  { %863 = vsyncadd [#allocation3], 4294967168 }
  0x45   :  { %864 = dma.done.wait [#allocation6], 2176  }
  0x46   :  { %865 = vsyncadd [#allocation6], 4294965120 }
  0x47   :  { %866 = dma.done.wait [#allocation9], 4096  }
  0x48   :  { %867 = vsyncadd [#allocation9], 4294963200 }
  0x49   :  { %868 = dma.done.wait [#allocation12], 2048  }
  0x4a   :  { %869 = vsyncadd [#allocation12], 4294965248  ;;  %v880_v0 = vmov 0.0   ;;  %vm881_vm0 = vmmov 0   ;;  %v144_v1 = vld [vmem:[#allocation8 + $0x78] sm:$0xff]  ;;  %v143_v3 = vld [vmem:[#allocation8 + $0x70] sm:$0xff] }
  0x4b   :  { %571 = vmatprep.subr.mxu0 %v880_v0  ;;  %606 = vmatprep.subr.mxu1 %v880_v0  ;;  %v127_v2 = vld [vmem:[#allocation7 + $0x78] sm:$0xff]  ;;  %v126_v4 = vld [vmem:[#allocation7 + $0x70] sm:$0xff]  ;;  %v142_v5 = vld [vmem:[#allocation8 + $0x68] sm:$0xff]  ;;  %s882_s19 = smov [#allocation13]  }
  0x4c   :  { %603 = vmatprep.mubr.msk.f32.mxu0 %vm881_vm0, %v880_v0  ;;  %638 = vmatprep.mubr.msk.f32.mxu1 %vm881_vm0, %v880_v0  ;;  %v125_v6 = vld [vmem:[#allocation7 + $0x68] sm:$0xff]  ;;  %v141_v7 = vld [vmem:[#allocation8 + $0x60] sm:$0xff]  ;;  %v140_v9 = vld [vmem:[#allocation8 + $0x58] sm:$0xff]  ;;  %s488_s20 = sshll.u32 %s882_s19, 4  ;;  %s489_s20 = int_to_ptr.vmem [resolvable:$true] %s488_s20 }
  0x4d   :  { %572 = vmatpush3.msra.mxu0 %v144_v1  ;;  %607 = vmatpush3.msra.mxu1 %v127_v2  ;;  %v124_v8 = vld [vmem:[#allocation7 + $0x60] sm:$0xff]  ;;  %v123_v10 = vld [vmem:[#allocation7 + $0x58] sm:$0xff]  ;;  %v139_v11 = vld [vmem:[#allocation8 + $0x50] sm:$0xff]  ;;  %s842_s21 = scalar_lea.vmem %s489_s20, 128  ;;  %p847_p3 = scmp.lt.s32.totalorder %s489_s20, %s489_s20 }
  0x4e   :  { %573 = vmatprep.subr.mxu0 %v880_v0  ;;  %608 = vmatprep.subr.mxu1 %v880_v0  ;;  %v122_v12 = vld [vmem:[#allocation7 + $0x50] sm:$0xff]  ;;  %v138_v13 = vld [vmem:[#allocation8 + $0x48] sm:$0xff]  ;;  %v137_v15 = vld [vmem:[#allocation8 + $0x40] sm:$0xff]  ;;  %p843_p2 = scmp.ne.s32.totalorder %s489_s20, %s842_s21  ;;  %p848_p4 = scmp.lt.s32.totalorder %s842_s21, %s842_s21 }
  0x4f   :  { %574 = vmatpush3.msra.mxu0 %v143_v3  ;;  %609 = vmatpush3.msra.mxu1 %v126_v4  ;;  %v121_v14 = vld [vmem:[#allocation7 + $0x48] sm:$0xff]  ;;  %v120_v16 = vld [vmem:[#allocation7 + $0x40] sm:$0xff]  ;;  %v136_v17 = vld [vmem:[#allocation8 + $0x38] sm:$0xff] }
  0x50   :  { %575 = vmatprep.subr.mxu0 %v880_v0  ;;  %610 = vmatprep.subr.mxu1 %v880_v0  ;;  %v119_v18 = vld [vmem:[#allocation7 + $0x38] sm:$0xff]  ;;  %v135_v19 = vld [vmem:[#allocation8 + $0x30] sm:$0xff]  ;;  %v134_v21 = vld [vmem:[#allocation8 + $0x28] sm:$0xff]  ;;  %p849_p5 = por %p848_p4, %p847_p3 }
  0x51   :  { %576 = vmatpush3.msra.mxu0 %v142_v5  ;;  %611 = vmatpush3.msra.mxu1 %v125_v6  ;;  %v118_v20 = vld [vmem:[#allocation7 + $0x30] sm:$0xff]  ;;  %v117_v22 = vld [vmem:[#allocation7 + $0x28] sm:$0xff]  ;;  %v133_v23 = vld [vmem:[#allocation8 + $0x20] sm:$0xff] }
  0x52   :  { %577 = vmatprep.subr.mxu0 %v880_v0  ;;  %612 = vmatprep.subr.mxu1 %v880_v0  ;;  %v116_v24 = vld [vmem:[#allocation7 + $0x20] sm:$0xff]  ;;  %v132_v25 = vld [vmem:[#allocation8 + $0x18] sm:$0xff]  ;;  %v131_v27 = vld [vmem:[#allocation8 + $0x10] sm:$0xff]  ;;  %p850_p6 = pnand %p849_p5, %p843_p2 }
  0x53   :  { %578 = vmatpush3.msra.mxu0 %v141_v7  ;;  %613 = vmatpush3.msra.mxu1 %v124_v8  ;;  %v115_v26 = vld [vmem:[#allocation7 + $0x18] sm:$0xff]  ;;  %v114_v28 = vld [vmem:[#allocation7 + $0x10] sm:$0xff]  ;;  %v130_v29 = vld [vmem:[#allocation8 + $0x8] sm:$0xff] }
  0x54   :  { %579 = vmatprep.subr.mxu0 %v880_v0  ;;  %614 = vmatprep.subr.mxu1 %v880_v0  ;;  %v113_v30 = vld [vmem:[#allocation7 + $0x8] sm:$0xff]  ;;  %v129_v31 = vld [vmem:[#allocation8] sm:$0xff]  ;;  %v128_v33 = vld [vmem:[#allocation5] sm:$0xff] }
  0x55   :  { %580 = vmatpush3.msra.mxu0 %v140_v9  ;;  %615 = vmatpush3.msra.mxu1 %v123_v10  ;;  %v112_v32 = vld [vmem:[#allocation7] sm:$0xff]  ;;  %v111_v34 = vld [vmem:[#allocation2] sm:$0xff]  ;;  %v309_v35 = vld [vmem:[#allocation10 + $0x78] sm:$0xff] }
  0x56   :  { %581 = vmatprep.subr.mxu0 %v880_v0  ;;  %616 = vmatprep.subr.mxu1 %v880_v0  ;;  %v308_v36 = vld [vmem:[#allocation10 + $0x70] sm:$0xff]  ;;  %v307_v37 = vld [vmem:[#allocation10 + $0x68] sm:$0xff]  ;;  %v306_v38 = vld [vmem:[#allocation10 + $0x60] sm:$0xff] }
  0x57   :  { %582 = vmatpush3.msra.mxu0 %v139_v11  ;;  %617 = vmatpush3.msra.mxu1 %v122_v12  ;;  %v305_v39 = vld [vmem:[#allocation10 + $0x58] sm:$0xff]  ;;  %v304_v40 = vld [vmem:[#allocation10 + $0x50] sm:$0xff]  ;;  %v303_v41 = vld [vmem:[#allocation10 + $0x48] sm:$0xff] }
  0x58   :  { %583 = vmatprep.subr.mxu0 %v880_v0  ;;  %618 = vmatprep.subr.mxu1 %v880_v0  ;;  %v302_v42 = vld [vmem:[#allocation10 + $0x40] sm:$0xff]  ;;  %v301_v43 = vld [vmem:[#allocation10 + $0x38] sm:$0xff]  ;;  %v300_v44 = vld [vmem:[#allocation10 + $0x30] sm:$0xff] }
  0x59   :  { %584 = vmatpush3.msra.mxu0 %v138_v13  ;;  %619 = vmatpush3.msra.mxu1 %v121_v14  ;;  %v299_v45 = vld [vmem:[#allocation10 + $0x28] sm:$0xff]  ;;  %v298_v46 = vld [vmem:[#allocation10 + $0x20] sm:$0xff]  ;;  %v297_v47 = vld [vmem:[#allocation10 + $0x18] sm:$0xff] }
  0x5a   :  { %585 = vmatprep.subr.mxu0 %v880_v0  ;;  %620 = vmatprep.subr.mxu1 %v880_v0  ;;  %v296_v48 = vld [vmem:[#allocation10 + $0x10] sm:$0xff]  ;;  %v295_v49 = vld [vmem:[#allocation10 + $0x8] sm:$0xff]  ;;  %v294_v50 = vld [vmem:[#allocation10] sm:$0xff] }
  0x5b   :  { %586 = vmatpush3.msra.mxu0 %v137_v15  ;;  %621 = vmatpush3.msra.mxu1 %v120_v16  ;;  %v403_v51 = vld [vmem:[#allocation11 + $0x78] sm:$0xff]  ;;  %v402_v52 = vld [vmem:[#allocation11 + $0x70] sm:$0xff]  ;;  %v401_v53 = vld [vmem:[#allocation11 + $0x68] sm:$0xff] }
  0x5c   :  { %587 = vmatprep.subr.mxu0 %v880_v0  ;;  %622 = vmatprep.subr.mxu1 %v880_v0  ;;  %v400_v54 = vld [vmem:[#allocation11 + $0x60] sm:$0xff]  ;;  %v399_v55 = vld [vmem:[#allocation11 + $0x58] sm:$0xff]  ;;  %v398_v56 = vld [vmem:[#allocation11 + $0x50] sm:$0xff] }
  0x5d   :  { %588 = vmatpush3.msra.mxu0 %v136_v17  ;;  %623 = vmatpush3.msra.mxu1 %v119_v18  ;;  %v397_v57 = vld [vmem:[#allocation11 + $0x48] sm:$0xff]  ;;  %v396_v58 = vld [vmem:[#allocation11 + $0x40] sm:$0xff]  ;;  %v395_v59 = vld [vmem:[#allocation11 + $0x38] sm:$0xff] }
  0x5e   :  { %589 = vmatprep.subr.mxu0 %v880_v0  ;;  %624 = vmatprep.subr.mxu1 %v880_v0  ;;  %v394_v60 = vld [vmem:[#allocation11 + $0x30] sm:$0xff]  ;;  %v393_v61 = vld [vmem:[#allocation11 + $0x28] sm:$0xff]  ;;  %v392_v62 = vld [vmem:[#allocation11 + $0x20] sm:$0xff] }
  0x5f   :  { %590 = vmatpush3.msra.mxu0 %v135_v19  ;;  %625 = vmatpush3.msra.mxu1 %v118_v20  ;;  %v391_v63 = vld [vmem:[#allocation11 + $0x18] sm:$0xff]  ;;  %v500_v3 = vld [vmem:[%s1051_s4] ss:$0 sm:$0xff]  ;;  %v389_v10 = vld [vmem:[#allocation11 + $0x8] sm:$0xff] }
  0x60   :  { %591 = vmatprep.subr.mxu0 %v880_v0  ;;  %626 = vmatprep.subr.mxu1 %v880_v0  ;;  %v390_v9 = vld [vmem:[#allocation11 + $0x10] sm:$0xff]  ;;  %v388_v11 = vld [vmem:[#allocation11] sm:$0xff] }
  0x61   :  { %592 = vmatpush3.msra.mxu0 %v134_v21  ;;  %627 = vmatpush3.msra.mxu1 %v117_v22  ;;  %v501_v12 = vld [vmem:[%s1053_s6] ss:$0 sm:$0xff] }
  0x62   :  { %593 = vmatprep.subr.mxu0 %v880_v0  ;;  %628 = vmatprep.subr.mxu1 %v880_v0  ;;  %v502_v17 = vld [vmem:[%s1055_s8] ss:$0 sm:$0xff] }
  0x63   :  { %594 = vmatpush3.msra.mxu0 %v133_v23  ;;  %629 = vmatpush3.msra.mxu1 %v116_v24 }
  0x64   :  { %595 = vmatprep.subr.mxu0 %v880_v0  ;;  %630 = vmatprep.subr.mxu1 %v880_v0 }
  0x65   :  { %596 = vmatpush3.msra.mxu0 %v132_v25  ;;  %631 = vmatpush3.msra.mxu1 %v115_v26 }
  0x66   :  { %597 = vmatprep.subr.mxu0 %v880_v0  ;;  %632 = vmatprep.subr.mxu1 %v880_v0 }
  0x67   :  { %598 = vmatpush3.msra.mxu0 %v131_v27  ;;  %633 = vmatpush3.msra.mxu1 %v114_v28 }
  0x68   :  { %599 = vmatprep.subr.mxu0 %v880_v0  ;;  %634 = vmatprep.subr.mxu1 %v880_v0 }
  0x69   :  { %600 = vmatpush3.msra.mxu0 %v130_v29  ;;  %635 = vmatpush3.msra.mxu1 %v113_v30 }
  0x6a   :  { %601 = vmatprep.subr.mxu0 %v880_v0  ;;  %636 = vmatprep.subr.mxu1 %v880_v0 }
  0x6b   :  { %602 = vmatpush3.msra.mxu0 %v129_v31  ;;  %637 = vmatpush3.msra.mxu1 %v112_v32 }
  0x6c   :  { %604 = vmatmul.mubr.f32.vlgmr.msra.gmra.mxu0 %v128_v33  ;;  %639 = vmatmul.mubr.f32.vlgmr.msra.gmra.mxu1 %v111_v34 }
  0x6d   :  { %641 = vmatprep.subr.mxu0 %v880_v0  ;;  %673 = vmatprep.mubr.msk.f32.mxu0 %vm881_vm0, %v880_v0 }
  0x6e   :  { %642 = vmatpush3.msra.mxu0 %v309_v35  ;;  %676 = vmatprep.subr.mxu1 %v880_v0 }
  0x6f   :  { %643 = vmatprep.subr.mxu0 %v880_v0  ;;  %708 = vmatprep.mubr.msk.f32.mxu1 %vm881_vm0, %v880_v0 }
  0x70   :  { %644 = vmatpush3.msra.mxu0 %v308_v36  ;;  %677 = vmatpush3.msra.mxu1 %v403_v51 }
  0x71   :  { %645 = vmatprep.subr.mxu0 %v880_v0  ;;  %678 = vmatprep.subr.mxu1 %v880_v0 }
  0x72   :  { %646 = vmatpush3.msra.mxu0 %v307_v37  ;;  %679 = vmatpush3.msra.mxu1 %v402_v52 }
  0x73   :  { %647 = vmatprep.subr.mxu0 %v880_v0  ;;  %680 = vmatprep.subr.mxu1 %v880_v0 }
  0x74   :  { %648 = vmatpush3.msra.mxu0 %v306_v38  ;;  %681 = vmatpush3.msra.mxu1 %v401_v53 }
  0x75   :  { %649 = vmatprep.subr.mxu0 %v880_v0  ;;  %682 = vmatprep.subr.mxu1 %v880_v0 }
  0x76   :  { %650 = vmatpush3.msra.mxu0 %v305_v39  ;;  %683 = vmatpush3.msra.mxu1 %v400_v54 }
  0x77   :  { %651 = vmatprep.subr.mxu0 %v880_v0  ;;  %684 = vmatprep.subr.mxu1 %v880_v0 }
  0x78   :  { %652 = vmatpush3.msra.mxu0 %v304_v40  ;;  %685 = vmatpush3.msra.mxu1 %v399_v55 }
  0x79   :  { %653 = vmatprep.subr.mxu0 %v880_v0  ;;  %686 = vmatprep.subr.mxu1 %v880_v0 }
  0x7a   :  { %654 = vmatpush3.msra.mxu0 %v303_v41  ;;  %687 = vmatpush3.msra.mxu1 %v398_v56 }
  0x7b   :  { %655 = vmatprep.subr.mxu0 %v880_v0  ;;  %688 = vmatprep.subr.mxu1 %v880_v0 }
  0x7c   :  { %656 = vmatpush3.msra.mxu0 %v302_v42  ;;  %689 = vmatpush3.msra.mxu1 %v397_v57 }
  0x7d   :  { %657 = vmatprep.subr.mxu0 %v880_v0  ;;  %690 = vmatprep.subr.mxu1 %v880_v0 }
  0x7e   :  { %658 = vmatpush3.msra.mxu0 %v301_v43  ;;  %691 = vmatpush3.msra.mxu1 %v396_v58 }
  0x7f   :  { %659 = vmatprep.subr.mxu0 %v880_v0  ;;  %692 = vmatprep.subr.mxu1 %v880_v0 }
  0x80   :  { %660 = vmatpush3.msra.mxu0 %v300_v44  ;;  %693 = vmatpush3.msra.mxu1 %v395_v59 }
  0x81   :  { %661 = vmatprep.subr.mxu0 %v880_v0  ;;  %694 = vmatprep.subr.mxu1 %v880_v0 }
  0x82   :  { %662 = vmatpush3.msra.mxu0 %v299_v45  ;;  %695 = vmatpush3.msra.mxu1 %v394_v60 }
  0x83   :  { %663 = vmatprep.subr.mxu0 %v880_v0  ;;  %696 = vmatprep.subr.mxu1 %v880_v0 }
  0x84   :  { %664 = vmatpush3.msra.mxu0 %v298_v46  ;;  %697 = vmatpush3.msra.mxu1 %v393_v61 }
  0x85   :  { %665 = vmatprep.subr.mxu0 %v880_v0  ;;  %698 = vmatprep.subr.mxu1 %v880_v0 }
  0x86   :  { %666 = vmatpush3.msra.mxu0 %v297_v47  ;;  %699 = vmatpush3.msra.mxu1 %v392_v62 }
  0x87   :  { %667 = vmatprep.subr.mxu0 %v880_v0  ;;  %700 = vmatprep.subr.mxu1 %v880_v0 }
  0x88   :  { %668 = vmatpush3.msra.mxu0 %v296_v48  ;;  %701 = vmatpush3.msra.mxu1 %v391_v63 }
  0x89   :  { %669 = vmatprep.subr.mxu0 %v880_v0  ;;  %702 = vmatprep.subr.mxu1 %v880_v0 }
  0x8a   :  { %670 = vmatpush3.msra.mxu0 %v295_v49  ;;  %703 = vmatpush3.msra.mxu1 %v390_v9 }
  0x8b   :  { %671 = vmatprep.subr.mxu0 %v880_v0  ;;  %704 = vmatprep.subr.mxu1 %v880_v0 }
  0x8c   :  { %672 = vmatpush3.msra.mxu0 %v294_v50  ;;  %705 = vmatpush3.msra.mxu1 %v389_v10 }
  0x8d   :  { %706 = vmatprep.subr.mxu1 %v880_v0 }
  0x8e   :  { %707 = vmatpush3.msra.mxu1 %v388_v11 }
 0x12c   :  { %v211_v1 = vpop.f32.mrf.mxu0  ;;  %v281_v2 = vpop.f32.mrf.mxu1 }
 0x12d   :  { %v282_v4 = vadd.f32 %v281_v2, %v211_v1 }
 0x12e   :  { %v605_v5 = vpop.f32.mrf.mxu0  ;;  %v640_v6 = vpop.f32.mrf.mxu1 }
 0x12f   :  { %v292_v7 = vadd.f32 %v500_v3, %v282_v4 }
 0x131   :  { %v293_v8 = vmax.f32 %v292_v7, 0.0 }
 0x133   :  { %674 = vmatmul.mubr.f32.vlgmr.msra.gmra.mxu0 %v293_v8 }
 0x1f3   :  { %v383_v13 = vpop.f32.mrf.mxu0 }
 0x1f4   :  { %v384_v14 = vadd.f32 %v501_v12, %v383_v13 }
 0x1f5   :  { %v675_v15 = vpop.f32.mrf.mxu0 }
 0x1f6   :  { %v387_v16 = vmax.f32 %v384_v14, 0.0 }
 0x1f8   :  { %709 = vmatmul.mubr.f32.vlgmr.msra.gmra.mxu1 %v387_v16 }
 0x2b8   :  { %v477_v18 = vpop.f32.mrf.mxu1 }
 0x2b9   :  { %v478_v19 = vadd.f32 %v502_v17, %v477_v18 }
 0x2ba   :  { %v710_v0 = vpop.f32.mrf.mxu1 }
 0x2bb   :  { %481 = vst [vmem:[#allocation13] sm:$0xff] %v478_v19 }
 0x2bc   :  { %853 = shalt.err (!%p850_p6)
}
 0x2bd   :  { %491 = dma.vmem_to_hbm [thread:$0]  %s489_s20, 128, %s1056_s9, [#allocation4]  }
 0x2be   :  { %870 = dma.done.wait [#allocation4], 128  }
 0x2bf   :  { %871 = vsyncadd [#allocation4], 4294967168 }
 0x2c0   :  { %495 = vsyncpa [#allocation3], 1 }
 0x2c1   :  { %496 = vsyncpa [#allocation6], 1 }
 0x2c2   :  { %497 = vsyncpa [#allocation9], 1 }
 0x2c3   :  { %498 = vsyncpa [#allocation12], 1 }
 0x2c4   :  { %499 = vsyncpa [#allocation4], 1 }

</bundles_post_ra>
